<compile_context>
chip_gen: v7x
topology: tpu7x:2x2x1
jax: 0.10.0
libtpu: 0.0.40
codegen_flags: <defaults>
</compile_context>

<pallas_src>
import functools

import jax
import jax.numpy as jnp
import numpy as np
from jax.experimental import pallas as pl
from jax.experimental.pallas import tpu as pltpu


def _cdiv(a, b):
    return -(-a // b)


def _vmem_capacity_bytes():
    try:
        return int(pltpu.get_tpu_info().vmem_capacity_bytes)
    except Exception:
        return 64 << 20  # conservative default (v7x per-TensorCore VMEM)


# --------------------------------------------------------------------------- #
# Kernels
# --------------------------------------------------------------------------- #
def _mla_single_pass_kernel(x_ref, w_ref, o_ref, *, compute_dtype=None):
    """Single-pass kernel: the whole sequence is resident, ordinary softmax.

    x_ref : (S, H)   inputs for this batch element
    w_ref : (tl, H)  attention-weight tile for this label tile
    o_ref : (tl, H)  output tile
    """
    x = x_ref[...]
    w = w_ref[...]
    xc = x if compute_dtype is None else x.astype(compute_dtype)
    wc = w if compute_dtype is None else w.astype(compute_dtype)

    # scores[l, s] = <attn_weight[l], inputs[s]>  -> MXU, contraction over H.
    scores = jnp.einsum("lh,sh->ls", wc, xc,
                        preferred_element_type=jnp.float32)          # (tl, S)

    m = scores.max(axis=-1, keepdims=True)                           # (tl, 1)
    p = jnp.exp(scores - m)                                          # (tl, S)
    inv_l = jnp.float32(1.0) / p.sum(axis=-1, keepdims=True)         # (tl, 1)

    pv = p if compute_dtype is None else p.astype(compute_dtype)
    out = jnp.dot(pv, xc, preferred_element_type=jnp.float32)        # (tl, H)
    o_ref[...] = (out * inv_l).astype(o_ref.dtype)


def _mla_stream_kernel(x_ref, w_ref, o_ref, m_sc, l_sc, acc_sc, *,
                       seq_len, ts, mask_tail, compute_dtype=None):
    """Streaming (flash-style online softmax) kernel over sequence tiles.

    x_ref  : (ts, H)  inputs tile for this batch / seq tile
    w_ref  : (tl, H)  attention-weight tile for this label tile
    o_ref  : (tl, H)  output tile (resident across the seq axis)
    m_sc   : (tl, 1)  running row max        (f32 VMEM scratch)
    l_sc   : (tl, 1)  running softmax denom  (f32 VMEM scratch)
    acc_sc : (tl, H)  running weighted sum   (f32 VMEM scratch)
    """
    s_idx = pl.program_id(2)

    @pl.when(s_idx == 0)
    def _():
        m_sc[...] = jnp.full_like(m_sc, -jnp.inf)
        l_sc[...] = jnp.zeros_like(l_sc)
        acc_sc[...] = jnp.zeros_like(acc_sc)

    x = x_ref[...]                                   # (ts, H)
    w = w_ref[...]                                   # (tl, H)

    if mask_tail:
        # Last sequence tile is partial: zero padded rows (kills any stale
        # VMEM garbage) and exclude padded columns from the softmax.
        row_ids = s_idx * ts + jax.lax.broadcasted_iota(jnp.int32, (ts, 1), 0)
        x = jnp.where(row_ids < seq_len, x, jnp.zeros_like(x))
        col_valid = (s_idx * ts
                     + jax.lax.broadcasted_iota(jnp.int32, (1, ts), 1)) < seq_len

    xc = x if compute_dtype is None else x.astype(compute_dtype)
    wc = w if compute_dtype is None else w.astype(compute_dtype)

    scores = jnp.einsum("lh,sh->ls", wc, xc,
                        preferred_element_type=jnp.float32)          # (tl, ts)
    if mask_tail:
        scores = jnp.where(col_valid, scores, -jnp.inf)

    m_prev = m_sc[...]                                               # (tl, 1)
    m_new = jnp.maximum(m_prev, scores.max(axis=-1, keepdims=True))
    alpha = jnp.exp(m_prev - m_new)                                  # rescale old stats
    p = jnp.exp(scores - m_new)                                      # (tl, ts)

    l_sc[...] = alpha * l_sc[...] + p.sum(axis=-1, keepdims=True)
    pv = p if compute_dtype is None else p.astype(compute_dtype)
    acc_sc[...] = alpha * acc_sc[...] + jnp.dot(
        pv, xc, preferred_element_type=jnp.float32)                  # (tl, H)
    m_sc[...] = m_new

    @pl.when(s_idx == pl.num_programs(2) - 1)
    def _():
        # One (tl,1) exact reciprocal + broadcast multiply instead of a
        # (tl,H) divide.  Exact division keeps the 1e-5 tolerance.
        inv_l = jnp.float32(1.0) / l_sc[...]
        o_ref[...] = (acc_sc[...] * inv_l).astype(o_ref.dtype)


# --------------------------------------------------------------------------- #
# Tile selection (generation aware)
# --------------------------------------------------------------------------- #
def _choose_tiles(B, S, L, H, vmem_cap, allow_single_pass=True):
    """Pick (tl, ts).  ts == S selects the single-pass kernel.

    VMEM footprint model (f32, default double-buffered pipelining):
      inputs tile 2*ts*H*4, weights tile 2*tl*H*4, output tile 2*tl*H*4,
      streaming accumulator tl*H*4 (+m/l), scores/p temporaries ~3*tl*ts*4.
    Budget ~= 75% of physical VMEM (=> ~48 MiB on v7x, ~96 MiB on v5e/v6e),
    leaving headroom for compiler temporaries.
    """
    f32 = 4
    budget = max(min(int(0.75 * vmem_cap), vmem_cap - (12 << 20)), 12 << 20)

    def footprint(tl, ts, streaming):
        b = (2 * ts + 4 * tl) * H * f32
        if streaming:
            b += (tl * H + 8 * tl) * f32
        b += 3 * tl * ts * f32
        return b

    # Large label tiles: every extra label tile re-streams the whole (B,S,H)
    # input tensor from HBM once, so take the biggest tl that fits.
    tl_cands = [L] if L <= 1024 else [1024, 512, 256, 128]

    # 1) Single pass: whole sequence resident, no online-softmax overhead.
    if allow_single_pass:
        for tl in tl_cands:
            if footprint(tl, S, streaming=False) <= budget:
                return tl, S

    # 2) Streaming: large 128-aligned sequence tiles to amortize the ~0.35 us
    #    per-grid-step overhead and fill the 256x256 MXU on v6e/v7x.
    ts_cands = [t for t in (2048, 1024, 512, 256, 128) if t < S] or [min(S, 128)]
    for tl in tl_cands:
        for ts in ts_cands:
            if footprint(tl, ts, streaming=True) <= budget:
                return tl, ts

    # 3) Last resort: minimal legal tiles.
    return min(L, 128), min(S, 128)


# --------------------------------------------------------------------------- #
# Wrapper
# --------------------------------------------------------------------------- #
def ml_attention2(inputs, attn_weight, label_ids=None, *,
                  force_streaming=False, tl=None, ts=None, compute_dtype=None):
    """MLAttention2 forward.

    inputs      : (B, S, H) float array
    attn_weight : (L, H)    float array
    label_ids   : optional int array -- subset of labels (F.embedding gather,
                  done wrapper-side with jnp.take; forward-only, so `sparse`
                  is irrelevant).
    compute_dtype : optional dtype (e.g. jnp.bfloat16) for the MXU operands;
                  default None keeps exact f32 matmuls (1e-5 accuracy).
    returns     : (B, L', H) where L' = len(label_ids) or L
    """
    attn_weight = jnp.asarray(attn_weight)
    if label_ids is not None:
        attn_weight = jnp.take(attn_weight, jnp.asarray(label_ids), axis=0)
    inputs = jnp.asarray(inputs)

    B, S, H = inputs.shape
    L = attn_weight.shape[0]

    vmem_cap = _vmem_capacity_bytes()
    tl_auto, ts_auto = _choose_tiles(B, S, L, H, vmem_cap,
                                     allow_single_pass=not force_streaming)

    if tl is None:
        tl = tl_auto
        # v7x megacore balance: keep at least 2 parallel (batch, label-tile)
        # blocks so the "parallel" grid axes can shard across both TensorCores.
        while B * _cdiv(L, tl) < 2 and tl > 8 and (tl // 2) % 8 == 0:
            tl //= 2
    tl = max(1, min(int(tl), L))
    ts = max(1, min(int(ts_auto if ts is None else ts), S))

    single_pass = (ts >= S) and not force_streaming
    n_l = _cdiv(L, tl)

    # Explicit scoped-VMEM limit sized from the chosen tiles (the 16/32 MiB
    # scoped default would otherwise cap the larger tiles).
    f32 = 4
    footprint = (2 * ts + 4 * tl) * H * f32 + 3 * tl * ts * f32
    if not single_pass:
        footprint += (tl * H + 8 * tl) * f32
    vmem_limit = int(min(vmem_cap - (4 << 20),
                         max(32 << 20, footprint + (16 << 20))))

    # Advisory cost estimate for XLA's scheduler around the custom call.
    cost = pl.CostEstimate(
        flops=4 * B * L * S * H,
        transcendentals=B * L * S,
        bytes_accessed=4 * (B * S * H * (1 if single_pass else n_l)
                            + L * H + B * L * H),
    )

    if single_pass:
        grid = (B, n_l)
        kernel = functools.partial(_mla_single_pass_kernel,
                                   compute_dtype=compute_dtype)
        in_specs = [
            # inputs: one batch row, full sequence, full hidden dim.  The block
            # index is constant across the label axis, so it is fetched once
            # per batch element.
            pl.BlockSpec((pl.Squeezed(), S, H), lambda b, li: (b, 0, 0)),
            # attention weights: one label tile, full hidden dim.
            pl.BlockSpec((tl, H), lambda b, li: (li, 0)),
        ]
        out_spec = pl.BlockSpec((pl.Squeezed(), tl, H), lambda b, li: (b, li, 0))
        scratch = []
        dims = ("parallel", "parallel")
    else:
        n_s = _cdiv(S, ts)
        grid = (B, n_l, n_s)
        kernel = functools.partial(_mla_stream_kernel,
                                   seq_len=S, ts=ts,
                                   mask_tail=(S % ts != 0),
                                   compute_dtype=compute_dtype)
        in_specs = [
            pl.BlockSpec((pl.Squeezed(), ts, H), lambda b, li, si: (b, si, 0)),
            pl.BlockSpec((tl, H), lambda b, li, si: (li, 0)),
        ]
        # Output block constant across the seq (reduction) axis -> accumulator
        # target, written only on the final seq step.
        out_spec = pl.BlockSpec((pl.Squeezed(), tl, H),
                                lambda b, li, si: (b, li, 0))
        scratch = [
            pltpu.VMEM((tl, 1), jnp.float32),   # running max
            pltpu.VMEM((tl, 1), jnp.float32),   # running denom
            pltpu.VMEM((tl, H), jnp.float32),   # running numerator
        ]
        dims = ("parallel", "parallel", "arbitrary")

    return pl.pallas_call(
        kernel,
        out_shape=jax.ShapeDtypeStruct((B, L, H), inputs.dtype),
        grid_spec=pltpu.PrefetchScalarGridSpec(
            num_scalar_prefetch=0,
            grid=grid,
            in_specs=in_specs,
            out_specs=out_spec,
            scratch_shapes=scratch,
        ),
        compiler_params=pltpu.CompilerParams(
            dimension_semantics=dims,
            vmem_limit_bytes=vmem_limit),
        cost_estimate=cost,
    )(inputs, attn_weight)


# --------------------------------------------------------------------------- #
# Reference & tests
# --------------------------------------------------------------------------- #
def _reference(inputs, attn_weight, label_ids=None):
    if label_ids is not None:
        attn_weight = jnp.take(attn_weight, label_ids, axis=0)
    attn = jnp.einsum("bsh,lh->bls", inputs, attn_weight)     # (B, L, S)
    attn = jax.nn.softmax(attn, axis=-1)
    return jnp.einsum("bls,bsh->blh", attn, inputs)           # (B, L, H)


def _xavier_uniform(key, shape):
    fan_out, fan_in = shape
    a = float(np.sqrt(6.0 / (fan_in + fan_out)))
    return jax.random.uniform(key, shape, jnp.float32, minval=-a, maxval=a)


if __name__ == "__main__":
    key = jax.random.PRNGKey(0)

    # --- Test 1: small shapes -> single-pass kernel ----------------------
    B, S, H, L = 2, 8, 32, 16
    k_x, k_w, key = jax.random.split(key, 3)
    inputs = jax.random.normal(k_x, (B, S, H), jnp.float32)
    attn_weight = _xavier_uniform(k_w, (L, H))

    out = jax.block_until_ready(ml_attention2(inputs, attn_weight))
    ref = _reference(inputs, attn_weight)
    np.testing.assert_allclose(np.asarray(out), np.asarray(ref),
                               rtol=1e-5, atol=1e-5)

    # --- Test 2: forced streaming path with a ragged sequence tail -------
    # (exercises the online softmax + cdiv grid + tail masking: S=200, ts=128)
    B2, S2, H2, L2 = 2, 200, 128, 64
    k_x2, k_w2, key = jax.random.split(key, 3)
    inputs2 = jax.random.normal(k_x2, (B2, S2, H2), jnp.float32)
    attn_weight2 = _xavier_uniform(k_w2, (L2, H2))

    out2 = jax.block_until_ready(
        ml_attention2(inputs2, attn_weight2, force_streaming=True, ts=128))
    ref2 = _reference(inputs2, attn_weight2)
    np.testing.assert_allclose(np.asarray(out2), np.asarray(ref2),
                               rtol=1e-5, atol=1e-5)

    # --- Test 3: label_ids path (embedding gather in the wrapper) --------
    label_ids = jnp.array([3, 7, 1, 0, 5, 2, 9, 11], dtype=jnp.int32)
    out3 = jax.block_until_ready(
        ml_attention2(inputs, attn_weight, label_ids=label_ids))
    ref3 = _reference(inputs, attn_weight, label_ids=label_ids)
    np.testing.assert_allclose(np.asarray(out3), np.asarray(ref3),
                               rtol=1e-5, atol=1e-5)

    print("KERNEL_OK")
</pallas_src>

<mosaic_0001>
module attributes {stable_mosaic.version = 11 : i64} {
  func.func @_mla_single_pass_kernel(%arg0: i32, %arg1: i32, %arg2: memref<1x8x32xf32, #tpu.memory_space<vmem>>, %arg3: memref<16x32xf32, #tpu.memory_space<vmem>>, %arg4: memref<1x16x32xf32, #tpu.memory_space<vmem>>) attributes {dimension_semantics = [#tpu.dimension_semantics<parallel>, #tpu.dimension_semantics<parallel>], iteration_bounds = array<i64: 2, 1>, scalar_prefetch = 0 : i64, scratch_operands = 0 : i64, tpu.core_type = #tpu.core_type<tc>, window_params = [{transform_indices = @transform_0, window_bounds = array<i64: 1, 8, 32>}, {transform_indices = @transform_1, window_bounds = array<i64: 16, 32>}, {transform_indices = @transform_2, window_bounds = array<i64: 1, 16, 32>}]} {
    %c0 = arith.constant 0 : index
    %c0_0 = arith.constant 0 : index
    %c0_1 = arith.constant 0 : index
    %0 = vector.load %arg2[%c0, %c0_0, %c0_1] : memref<1x8x32xf32, #tpu.memory_space<vmem>>, vector<1x8x32xf32>
    %1 = vector.shape_cast %0 : vector<1x8x32xf32> to vector<8x32xf32>
    %c0_2 = arith.constant 0 : index
    %c0_3 = arith.constant 0 : index
    %2 = vector.load %arg3[%c0_2, %c0_3] : memref<16x32xf32, #tpu.memory_space<vmem>>, vector<16x32xf32>
    "tpu.trace_start"() <{level = 10 : i32, message = "lh,sh->ls"}> : () -> ()
    %cst = arith.constant dense<0.000000e+00> : vector<16x8xf32>
    %3 = tpu.matmul %2, %1, %cst {dimension_numbers = #tpu.dot_dimension_numbers<[1], [1], [0], [0], [0, 0, 1, 0], [], []>} : vector<16x32xf32>, vector<8x32xf32>, vector<16x8xf32> -> vector<16x8xf32>
    "tpu.trace_stop"() : () -> ()
    %cst_4 = arith.constant dense<0xFF800000> : vector<16xf32>
    %4 = vector.multi_reduction <maximumf>, %3, %cst_4 [1] : vector<16x8xf32> to vector<16xf32>
    %5 = vector.shape_cast %4 : vector<16xf32> to vector<16x1xf32>
    %6 = vector.broadcast %5 : vector<16x1xf32> to vector<16x8xf32>
    %7 = arith.subf %3, %6 : vector<16x8xf32>
    %8 = math.exp %7 : vector<16x8xf32>
    %cst_5 = arith.constant dense<0.000000e+00> : vector<16xf32>
    %9 = vector.multi_reduction <add>, %8, %cst_5 [1] : vector<16x8xf32> to vector<16xf32>
    %10 = vector.shape_cast %9 : vector<16xf32> to vector<16x1xf32>
    %cst_6 = arith.constant 1.000000e+00 : f32
    %11 = vector.broadcast %cst_6 : f32 to vector<16x1xf32>
    %12 = arith.divf %11, %10 : vector<16x1xf32>
    %cst_7 = arith.constant dense<0.000000e+00> : vector<16x32xf32>
    %13 = tpu.matmul %8, %1, %cst_7 {dimension_numbers = #tpu.dot_dimension_numbers<[1], [0], [0], [1], [0, 0, 1, 1], [], []>} : vector<16x8xf32>, vector<8x32xf32>, vector<16x32xf32> -> vector<16x32xf32>
    %14 = vector.broadcast %12 : vector<16x1xf32> to vector<16x32xf32>
    %15 = arith.mulf %13, %14 : vector<16x32xf32>
    %c0_8 = arith.constant 0 : index
    %c0_9 = arith.constant 0 : index
    %c0_10 = arith.constant 0 : index
    %16 = vector.load %arg4[%c0_8, %c0_9, %c0_10] : memref<1x16x32xf32, #tpu.memory_space<vmem>>, vector<1x16x32xf32>
    %17 = vector.shape_cast %16 : vector<1x16x32xf32> to vector<16x32xf32>
    %18 = vector.shape_cast %15 : vector<16x32xf32> to vector<1x16x32xf32>
    tpu.vector_store %arg4[%c0_8, %c0_9, %c0_10], %18 {strides = array<i32>} : memref<1x16x32xf32, #tpu.memory_space<vmem>>, vector<1x16x32xf32>,
    return
  }
  func.func @transform_0(%arg0: i32, %arg1: i32) -> (i32, i32, i32) {
    %c0_i32 = arith.constant 0 : i32
    %c0_i32_0 = arith.constant 0 : i32
    %c0_i32_1 = arith.constant 0 : i32
    return %arg0, %c0_i32, %c0_i32_0 : i32, i32, i32
  }
  func.func @transform_1(%arg0: i32, %arg1: i32) -> (i32, i32) {
    %c0_i32 = arith.constant 0 : i32
    %c0_i32_0 = arith.constant 0 : i32
    return %arg1, %c0_i32 : i32, i32
  }
  func.func @transform_2(%arg0: i32, %arg1: i32) -> (i32, i32, i32) {
    %c0_i32 = arith.constant 0 : i32
    %c0_i32_0 = arith.constant 0 : i32
    return %arg0, %arg1, %c0_i32 : i32, i32, i32
  }
}

</mosaic_0001>

<bundles_post_ra>
// kernel: tpu_custom_call.1
= control target key start
LH: loop header
LB: loop body
LE: loop exit
PB: predicated region body
PF: predicated region fallthrough
CT: control target
= control target key end

     0   :  { %7 = vsyncpa [#allocation3], 0  ;;  %s1026_s0 = inlined_call_operand.hbm [shape: f32[2,8,32], index: 0, kind: input, shape index: {}]   ;;  %s1027_s1 = inlined_call_operand.hbm [shape: f32[16,32], index: 1, kind: input, shape index: {}]   ;;  %s1028_s2 = inlined_call_operand.hbm [shape: f32[2,16,32], index: 2, kind: output, shape index: {}]  }
   0x1   :  { %9 = vsyncpa [#allocation3 + $0x1], 0 }
   0x2   :  { %10 = vsyncpa [#allocation6], 0 }
   0x3   :  { %11 = vsyncpa [#allocation4], 0 }
   0x4   :  { %13 = vsyncpa [#allocation4 + $0x1], 0  ;;  %s797_s9 = smov 0   ;;  %s799_s10 = smov 0  }
   0x5   :  { %s801_s11 = smov 0   ;;  %s803_s12 = smov 0  }
   0x6   :  { %s805_s13 = smov 0   ;;  %s807_s14 = smov 0  }
   0x7 LB: > { %s506_s15 = sadd.s32 4294967295, %s773_s14   ;;  %s507_s16 = sadd.s32 4294967294, %s773_s14   ;;  %s773_s14 = sphi %s807_s14, %s19_s14   ;;  %s769_s13 = sphi %s805_s13, %s1052_s13   ;;  %s765_s12 = sphi %s803_s12, %s1051_s12   ;;  %s761_s11 = sphi %s801_s11, %s1050_s11   ;;  %s757_s10 = sphi %s799_s10, %s1049_s10   ;;  %s753_s9 = sphi %s797_s9, %s1048_s9  }
   0x8   : > { %p51_p0 = scmp.ne.s32.totalorder %s757_s10, %s753_s9  ;;  %p831_p1 = scmp.eq.s32.totalorder %s506_s15, 0 }
   0x9   : > { %p835_p2 = scmp.eq.s32.totalorder %s506_s15, 1  ;;  %p109_p3 = scmp.eq.s32.totalorder %s507_s16, 1 }
   0xa   : > { %s1033_s17 = scalar_select %p831_p1, 1, 0 }
   0xb   : > { %s1034_s18 = scalar_select %p835_p2, 1, 0 }
   0xc   : > { %p841_p4 = por %p831_p1, %p51_p0  ;;  %p508_p5 = scmp.ge.s32.totalorder %s773_s14, 1 }
   0xd   : > { %p846_p6 = por %p109_p3, %p51_p0  ;;  %p116_p7 = scmp.lt.s32.totalorder %s773_s14, 3 }
   0xe   : > { %s1035_s19 = scalar_select %p841_p4, 1, 0 }
   0xf   : > { %s1036_s20 = scalar_select %p846_p6, 1, 0 }
  0x10   : > { %p851_p8 = pnand %p508_p5, %p116_p7  ;;  %s775_s22 = smov [#allocation5]  }
  0x11   : > { %s131_s23 = sshll.u32 %s775_s22, 4  ;;  %s31_s25 = sadd.s32 1, %s769_s13  ;;  %s132_s23 = int_to_ptr.vmem [resolvable:$true] %s131_s23 }
  0x12   : > { %s1037_s21 = scalar_select %p851_p8, 1, 0 }
  0x13   : > { %p552_p9 = pneg %p851_p8  ;;  %s629_s28 = scalar_lea.hbm %s1027_s1, 256 }
  0x14   : > { %p630_p12 = scmp.ne.s32.totalorder %s1027_s1, %s629_s28  ;;  %p636_p5 = scmp.lt.u32.totalorder %s629_s28, %s1027_s1 }
  0x15   : > { %p860_p11 = pnand %p552_p9, %p831_p1 }
  0x17   : > { %p631_p13 = pneg %p860_p11 }
  0x19   : > { %p632_p0 = pnand %p631_p13, %p630_p12 }
  0x1b   : > { %p633_p3 = pneg %p632_p0 }
  0x1d   : > { %p638_p7 = pnand %p636_p5, %p633_p3 }
  0x1f   : > { %641 = shalt.err (!%p638_p7)
}
  0x20   : > { %s642_s5 = scalar_lea.vmem %s132_s23, 256  ;;  %p650_p1 = scmp.lt.s32.totalorder %s132_s23, %s132_s23 }
  0x21   : > { %p643_p9 = scmp.ne.s32.totalorder %s132_s23, %s642_s5  ;;  %p651_p4 = scmp.lt.s32.totalorder %s642_s5, %s642_s5 }
  0x23   : > { %p645_p10 = pnand %p643_p9, %p631_p13  ;;  %p652_p8 = por %p651_p4, %p650_p1 }
  0x25   : > { %p646_p6 = pneg %p645_p10 }
  0x27   : > { %p653_p2 = pnand %p652_p8, %p646_p6 }
  0x29   : > { %656 = shalt.err (!%p653_p2)
}
  0x2a   : > { %s776_s6 = smov 128   ;;  %s777_s7 = smov 8  }
  0x2b   : > { %555 = dma.hbm_to_vmem [thread:$0]  (!%p860_p11), %s1027_s1, 256, %s132_s23, [#allocation6], %s776_s6, %s776_s6, %s777_s7  }
  0x2c   : > { %p33_p1 = scmp.ge.s32.totalorder %s31_s25, 2  ;;  %s38_s16 = sadd.s32 1, %s761_s11 }
  0x2d   : > { %p45_p2 = scmp.ne.s32.totalorder %s761_s11, %s757_s10  ;;  %p46_p4 = scmp.eq.s32.totalorder %s773_s14, 0 }
  0x2e   : > { %s1054_s25 = smov (%p33_p1, %s31_s25), 0  ;;  %p1040_p8 = scmp.ne.s32.totalorder %s1034_s18, 0 }
  0x2f   : > { %p887_p6 = por %p46_p4, %p45_p2  ;;  %s35_s24 = ssub.s32 %s769_s13, %s1054_s25 }
  0x30   : > { %p893_p10 = por %p1040_p8, %p45_p2  ;;  %p565_p12 = scmp.lt.s32.totalorder %s773_s14, 2 }
  0x31   : > { %p36_p11 = scmp.eq.s32.totalorder %s35_s24, 0  ;;  %s145_s23 = sand.u32 1, %s761_s11  }
  0x32   : > { %s511_s27 = sshll.u32 %s145_s23, 3  ;;  %s512_s29 = sshll.u32 %s769_s13, 7 }
  0x33   : > { %s902_s28 = scalar_select %p36_p11, %s761_s11, %s38_s16  }
  0x34   : > { %s908_s4 = scalar_lea.hbm %s1026_s0, %s512_s29  ;;  %s149_s18 = scalar_lea.vmem [#allocation2], %s511_s27 }
  0x35   : > { %s156_s5 = sshll.u32 %s149_s18, 4  ;;  %p914_p13 = pnand %p565_p12, %p887_p6  ;;  %s910_s5 = int_to_ptr.vmem [resolvable:$true] %s156_s5 }
  0x36   : > { %s146_s7 = scalar_lea.sflag [#allocation3], %s145_s23  ;;  %s657_s8 = scalar_lea.hbm %s908_s4, 128 }
  0x37   : > { %p658_p0 = scmp.ne.s32.totalorder %s908_s4, %s657_s8  ;;  %p659_p3 = pneg %p914_p13 }
  0x38   : > { %s662_s24 = scalar_lea.hbm %s1026_s0, 256  ;;  %p663_p9 = scmp.lt.u32.totalorder %s908_s4, %s1026_s0 }
  0x39   : > { %p660_p5 = pnand %p659_p3, %p658_p0  ;;  %p664_p1 = scmp.lt.u32.totalorder %s662_s24, %s657_s8 }
  0x3a   : > { %p666_p4 = scmp.lt.u32.totalorder %s657_s8, %s908_s4 }
  0x3b   : > { %p661_p7 = pneg %p660_p5  ;;  %p665_p2 = por %p664_p1, %p663_p9 }
  0x3d   : > { %p667_p6 = por %p666_p4, %p665_p2 }
  0x3f   : > { %p668_p8 = pnand %p667_p6, %p661_p7 }
  0x41   : > { %671 = shalt.err (!%p668_p8)
}
  0x42   : > { %s672_s23 = scalar_lea.vmem %s910_s5, 128  ;;  %s778_s29 = smov [#allocation2]  }
  0x43   : > { %p673_p12 = scmp.ne.s32.totalorder %s910_s5, %s672_s23  ;;  %s677_s30 = sshll.u32 %s778_s29, 4  ;;  %s678_s30 = int_to_ptr.vmem [resolvable:$false] %s677_s30 }
  0x44   : > { %s679_s3 = scalar_lea.vmem %s678_s30, 256  ;;  %p680_p5 = scmp.lt.s32.totalorder %s910_s5, %s678_s30 }
  0x45   : > { %p675_p11 = pnand %p673_p12, %p659_p3  ;;  %p681_p9 = scmp.lt.s32.totalorder %s679_s3, %s672_s23 }
  0x47   : > { %p676_p0 = pneg %p675_p11  ;;  %p682_p1 = por %p681_p9, %p680_p5 }
  0x49   : > { %p683_p2 = pnand %p682_p1, %p676_p0 }
  0x4b   : > { %686 = shalt.err (!%p683_p2)
}
  0x4c   : > { %559 = dma.hbm_to_vmem [thread:$0]  (!%p914_p13), %s908_s4, 128, %s910_s5, %s146_s7  }
  0x4d   : > { %p1043_p7 = scmp.ne.s32.totalorder %s1037_s21, 0 }
  0x4e   : > { %s946_s18 = sand.u32 (!%p1043_p7), 1, %s757_s10   ;;  %p1044_p3 = scmp.ne.s32.totalorder (!%p1043_p7), %s1035_s19, 0 }
  0x4f   : > { %165 = sbr.rel (%p1043_p7) target bundleno = 700 (0x2bc), region = 28  ;;  %s514_s8 = sshll.u32 (!%p1043_p7), %s946_s18, 3 }
  0x50   : > { %s168_s15 = scalar_lea.sflag (!%p1043_p7), [#allocation3], %s946_s18  ;;  %s171_s16 = scalar_lea.vmem (!%p1043_p7), [#allocation2], %s514_s8 }
  0x56   : > { %740 = dma.done.wait (%p1044_p3), %s168_s15, 128  }
  0x57   : > { %742 = vsyncadd (%p1044_p3), %s168_s15, 4294967168  ;;  %p1045_p4 = scmp.ne.s32.totalorder %s1033_s17, 0 }
  0x59   : > { %744 = dma.done.wait (%p1045_p4), [#allocation6], 256  }
  0x5a   : > { %746 = vsyncadd (%p1045_p4), [#allocation6], 4294967040  ;;  %vm201_vm0 = vcmask 261120   ;;  %v198_v0 = vld [vmem:[%s171_s16] sm:$0xff]  ;;  %v199_v1 = vld [vmem:[#allocation5] sm:$0xff]  ;;  %vm286_vm1 = vcmask 64512  }
  0x5b   : > { %534 = vmatprep.subr.msk.mxu0 %vm201_vm0, %v198_v0  ;;  %536 = vmatprep.mubr.msk.f32.mxu0 %vm201_vm0, %v199_v1  ;;  %v200_v2 = vld [vmem:[#allocation5 + $0x8] sm:$0xff]  ;;  %s516_s17 = sshll.u32 %s946_s18, 4  ;;  %s527_s4 = sshll.u32 %s765_s12, 8 }
  0x5c   : > { %535 = vmatpush3.xpose.msk.msra.mxu0 %vm201_vm0, %v198_v0  ;;  %539 = vmatprep.subr.mxu1 %v198_v0  ;;  %s195_s19 = scalar_lea.vmem [#allocation7], %s516_s17  ;;  %s975_s7 = scalar_lea.hbm %s1028_s2, %s527_s4 }
  0x5d   : > { %540 = vmatpush3.msra.mxu1 %v198_v0  ;;  %s410_s21 = sshll.u32 %s195_s19, 4  ;;  %s395_s12 = scalar_lea.sflag [#allocation4], %s946_s18  ;;  %s970_s21 = int_to_ptr.vmem [resolvable:$true] %s410_s21 }
  0x5e   : > { %s687_s24 = scalar_lea.vmem %s970_s21, 256  ;;  %s779_s22 = smov [#allocation7]  }
  0x5f   : > { %537 = vmatmul.mubr.msk.f32.vlgmr.msra.gmra.mrb[0].mxu0 %vm201_vm0, %v200_v2  ;;  %p688_p13 = scmp.ne.s32.totalorder %s970_s21, %s687_s24  ;;  %s691_s27 = sshll.u32 %s779_s22, 4  ;;  %s692_s27 = int_to_ptr.vmem [resolvable:$false] %s691_s27 }
  0x60   : > { %s693_s23 = scalar_lea.vmem %s692_s27, 512  ;;  %p694_p12 = scmp.lt.s32.totalorder %s970_s21, %s692_s27 }
  0x61   : > { %p689_p6 = pnand %p688_p13, %p893_p10  ;;  %p695_p11 = scmp.lt.s32.totalorder %s693_s23, %s687_s24 }
  0x63   : > { %p690_p8 = pneg %p689_p6  ;;  %p696_p0 = por %p695_p11, %p694_p12 }
  0x65   : > { %p697_p5 = pnand %p696_p0, %p690_p8 }
 0x132   : > { %v538_v3 = vpop.f32.mrb[0].mxu0 }
 0x133   : > { %v277_v4 = vpop.f32.mrb[1].mxu0  ;;  %v290_v6 = vsel %vm286_vm1, %v538_v3, -inf }
 0x134   : > { %v287_v5 = vsel %vm286_vm1, %v277_v4, -inf }
 0x135   : > { %288 = vmax.xlane.f32.xlu0 %v287_v5 }
 0x139   : > { %291 = vmax.xlane.f32.xlu0 %v290_v6 }
 0x1c2   : > { %v289_v7 = vpop.xlane.xlu0 %288 }
 0x1c3   : > { %v293_v8 = vsub.f32 %v277_v4, %v289_v7 }
 0x1c5   : > { %v295_v9 = vmul.f32 1.442695, %v293_v8 }
 0x1c6   : > { %v292_v10 = vpop.xlane.xlu0 %291 }
 0x1c7   : > { %621 = vpow2.f32 %v295_v9  ;;  %v294_v11 = vsub.f32 %v538_v3, %v292_v10 }
 0x1c9   : > { %v297_v12 = vmul.f32 1.442695, %v294_v11 }
 0x1cb   : > { %623 = vpow2.f32 %v297_v12 }
 0x1d1   : > { %v622_v13 = vpop.eup %621 }
 0x1d2   : > { %541 = vmatprep.mubr.msk.f32.mxu1 %vm286_vm1, %v622_v13  ;;  %v299_v14 = vsel %vm286_vm1, %v622_v13, 0.0 }
 0x1d3   : > { %300 = vadd.xlane.f32.xlu1 %v299_v14 }
 0x1d5   : > { %v624_v15 = vpop.eup %623 }
 0x1d6   : > { %542 = vmatmul.mubr.msk.f32.vlgmr.msra.gmra.mrb[0].mxu1 %vm286_vm1, %v624_v15  ;;  %v302_v16 = vsel %vm286_vm1, %v624_v15, 0.0 }
 0x1d7   : > { %303 = vadd.xlane.f32.xlu1 %v302_v16 }
 0x260   : > { %v301_v17 = vpop.xlane.xlu1 %300 }
 0x264   : > { %v304_v18 = vpop.xlane.xlu1 %303 }
 0x265   : > { %625 = vrcp.f32 %v304_v18 }
 0x266   : > { %627 = vrcp.f32 %v301_v17 }
 0x26f   : > { %v626_v19 = vpop.eup %625 }
 0x270   : > { %v628_v21 = vpop.eup %627 }
 0x2a9   : > { %v543_v20 = vpop.f32.mrb[0].mxu1 }
 0x2aa   : > { %v391_v22 = vmul.f32 %v626_v19, %v543_v20  ;;  %v381_v23 = vpop.f32.mrb[1].mxu1 }
 0x2ab   : > { %v390_v24 = vmul.f32 %v628_v21, %v381_v23 }
 0x2ac   : > { %393 = vst.msk [vmem:[%s195_s19 + $0x8] sm:$0xff] %vm201_vm0, %v391_v22 }
 0x2ad   : > { %392 = vst.msk [vmem:[%s195_s19] sm:$0xff] %vm201_vm0, %v390_v24 }
 0x2ae   : > { %700 = shalt.err (!%p697_p5)
}
 0x2af   : > { %s701_s29 = scalar_lea.hbm %s975_s7, 256  ;;  %s705_s8 = scalar_lea.hbm %s1028_s2, 512 }
 0x2b0   : > { %p702_p9 = scmp.ne.s32.totalorder %s975_s7, %s701_s29  ;;  %p706_p7 = scmp.lt.u32.totalorder %s975_s7, %s1028_s2 }
 0x2b1   : > { %p707_p3 = scmp.lt.u32.totalorder %s705_s8, %s701_s29  ;;  %p709_p13 = scmp.lt.u32.totalorder %s701_s29, %s975_s7 }
 0x2b2   : > { %p703_p1 = pnand %p702_p9, %p893_p10 }
 0x2b3   : > { %p708_p4 = por %p707_p3, %p706_p7 }
 0x2b4   : > { %p704_p2 = pneg %p703_p1 }
 0x2b5   : > { %p710_p6 = por %p709_p13, %p708_p4 }
 0x2b7   : > { %p711_p8 = pnand %p710_p6, %p704_p2 }
 0x2b9   : > { %714 = shalt.err (!%p711_p8)
}
 0x2ba   : > { %s780_s17 = smov 128   ;;  %s781_s19 = smov 8  }
 0x2bb   : > { %550 = dma.vmem_to_hbm [thread:$0]  (%p893_p10), %s970_s21, 256, %s975_s7, %s395_s12, %s780_s17, %s780_s17, %s781_s19  }
 0x2bc PF: > { %s425_s4 = sand.u32 1, %s753_s9   ;;  %p1046_p12 = scmp.ne.s32.totalorder %s1036_s20, 0 }
 0x2bd   : > { %p1047_p11 = scmp.ge.s32.totalorder %s773_s14, 2  ;;  %s426_s5 = scalar_lea.sflag [#allocation4], %s425_s4 }
 0x2bf   : > { %p561_p0 = pnand %p1047_p11, %p1046_p12 }
 0x2c1   : > { %748 = dma.done.wait (!%p561_p0), %s426_s5, 256  }
 0x2c2   : > { %750 = vsyncadd (!%p561_p0), %s426_s5, 4294967040  ;;  %s19_s14 = sadd.s32 1, %s773_s14   ;;  %s1048_s9 = smov %s757_s10 }
 0x2c3   : > { %p16_p5 = scmp.ge.s32.totalorder %s19_s14, 4   ;;  %s1049_s10 = smov %s761_s11 }
 0x2c4   : > { %s1050_s11 = smov %s902_s28  ;;  %s1051_s12 = smov %s769_s13 }
 0x2c5   : > { %s1052_s13 = smov %s1054_s25  ;;  %18 = sbr.rel (!%p16_p5) target bundleno = 7 (0x7), region = 78 }
 0x2cc   :  { %431 = vsyncpa [#allocation3], 1 }
 0x2cd   :  { %433 = vsyncpa [#allocation3 + $0x1], 1 }
 0x2ce   :  { %434 = vsyncpa [#allocation6], 1 }
 0x2cf   :  { %435 = vsyncpa [#allocation4], 1 }
 0x2d0   :  { %437 = vsyncpa [#allocation4 + $0x1], 1 }

</bundles_post_ra>
